<compile_context>
chip_gen: v7x
topology: tpu7x:2x2x1
jax: 0.10.0
libtpu: 0.0.40
codegen_flags: <defaults>
</compile_context>

<pallas_src>
import jax
import jax.numpy as jnp
from jax import lax
from jax.experimental import pallas as pl
from jax.experimental.pallas import tpu as pltpu

NUM_CLASSES = 2
IN_FEATURES = 256
TILE_B = 1024  # 1 MiB f32 feature tile; x2 for double buffering = 2 MiB


def _round_up(x, m):
    return ((x + m - 1) // m) * m


def _linear_kernel(x_ref, w_ref, b_ref, o_ref):
    # x_ref: (tile_b, 256)   w_ref: (C, 256)   b_ref: (C, 1)   o_ref: (C, tile_b)
    # Contract the 256-feature axis of both operands -> lane-dense (C, tile_b).
    acc = lax.dot_general(
        w_ref[...], x_ref[...],
        dimension_numbers=(((1,), (1,)), ((), ())),
        preferred_element_type=jnp.float32,
    )
    o_ref[...] = (acc + b_ref[...]).astype(o_ref.dtype)


def linear_classifier_forward(feature, weight, bias, tile_b=TILE_B):
    """feature: (B, 256) f32; weight: (C, 256) f32 (PyTorch layout); bias: (C,) f32."""
    B, F = feature.shape
    C = weight.shape[0]
    assert F == IN_FEATURES and weight.shape == (C, F) and bias.shape == (C,)

    # Pick the batch tile: at most TILE_B, at least a sublane-aligned B.
    tile_b = min(tile_b, _round_up(B, 8))
    b_padded = _round_up(B, tile_b)
    if b_padded != B:
        feature = jnp.pad(feature, ((0, b_padded - B), (0, 0)))

    b_col = bias.reshape(C, 1).astype(jnp.float32)  # broadcast over lanes in-kernel

    grid = (b_padded // tile_b,)

    out_t = pl.pallas_call(
        _linear_kernel,
        out_shape=jax.ShapeDtypeStruct((C, b_padded), feature.dtype),
        grid_spec=pltpu.PrefetchScalarGridSpec(
            num_scalar_prefetch=0,
            grid=grid,
            in_specs=[
                # feature: streamed batch tiles (auto double-buffered)
                pl.BlockSpec((tile_b, F), lambda i: (i, 0)),
                # weight / bias: constant index_map -> resident across grid steps
                pl.BlockSpec((C, F), lambda i: (0, 0)),
                pl.BlockSpec((C, 1), lambda i: (0, 0)),
            ],
            # lane-dense transposed output tile
            out_specs=pl.BlockSpec((C, tile_b), lambda i: (0, i)),
        ),
        compiler_params=pltpu.CompilerParams(
            dimension_semantics=("parallel",),
        ),
    )(feature, weight, b_col)

    # back to PyTorch layout (B, C); drop padded rows
    return out_t.T[:B]


def init_params(key, num_classes=NUM_CLASSES, in_features=IN_FEATURES):
    """Deterministic init matching nn.Linear's default U(-1/sqrt(fan_in), 1/sqrt(fan_in))."""
    kw, kb = jax.random.split(key)
    bound = 1.0 / jnp.sqrt(jnp.float32(in_features))
    weight = jax.random.uniform(
        kw, (num_classes, in_features), jnp.float32, minval=-bound, maxval=bound)
    bias = jax.random.uniform(
        kb, (num_classes,), jnp.float32, minval=-bound, maxval=bound)
    return weight, bias


if __name__ == "__main__":
    key = jax.random.PRNGKey(0)
    k_x, k_x2, k_p = jax.random.split(key, 3)

    weight, bias = init_params(k_p)

    # Small case (exercises the padded single-tile path).
    B_small = 4
    feature = jax.random.normal(k_x, (B_small, IN_FEATURES), jnp.float32)
    out = jax.block_until_ready(linear_classifier_forward(feature, weight, bias))
    ref = feature @ weight.T + bias
    assert out.shape == (B_small, NUM_CLASSES)
    assert jnp.allclose(out, ref, atol=1e-5, rtol=1e-5)

    # Larger case (exercises the multi-tile pipelined path, incl. tail padding).
    B_big = 2304  # not a multiple of TILE_B
    feature_big = jax.random.normal(k_x2, (B_big, IN_FEATURES), jnp.float32)
    out_big = jax.block_until_ready(linear_classifier_forward(feature_big, weight, bias))
    ref_big = feature_big @ weight.T + bias
    assert out_big.shape == (B_big, NUM_CLASSES)
    assert jnp.allclose(out_big, ref_big, atol=1e-5, rtol=1e-5)

    print("KERNEL_OK")
</pallas_src>

<mosaic_0001>
module attributes {stable_mosaic.version = 11 : i64} {
  func.func @_linear_kernel(%arg0: i32, %arg1: memref<8x256xf32, #tpu.memory_space<vmem>>, %arg2: memref<2x256xf32, #tpu.memory_space<vmem>>, %arg3: memref<2x1xf32, #tpu.memory_space<vmem>>, %arg4: memref<2x8xf32, #tpu.memory_space<vmem>>) attributes {dimension_semantics = [#tpu.dimension_semantics<parallel>], iteration_bounds = array<i64: 1>, scalar_prefetch = 0 : i64, scratch_operands = 0 : i64, tpu.core_type = #tpu.core_type<tc>, window_params = [{transform_indices = @transform_0, window_bounds = array<i64: 8, 256>}, {pipeline_mode = #tpu.pipeline_mode<synchronous>, transform_indices = @transform_1, window_bounds = array<i64: 2, 256>}, {pipeline_mode = #tpu.pipeline_mode<synchronous>, transform_indices = @transform_2, window_bounds = array<i64: 2, 1>}, {transform_indices = @transform_3, window_bounds = array<i64: 2, 8>}]} {
    %c0 = arith.constant 0 : index
    %c0_0 = arith.constant 0 : index
    %0 = vector.load %arg2[%c0, %c0_0] : memref<2x256xf32, #tpu.memory_space<vmem>>, vector<2x256xf32>
    %c0_1 = arith.constant 0 : index
    %c0_2 = arith.constant 0 : index
    %1 = vector.load %arg1[%c0_1, %c0_2] : memref<8x256xf32, #tpu.memory_space<vmem>>, vector<8x256xf32>
    %cst = arith.constant dense<0.000000e+00> : vector<2x8xf32>
    %2 = tpu.matmul %0, %1, %cst {dimension_numbers = #tpu.dot_dimension_numbers<[1], [1], [0], [0], [0, 0, 1, 0], [], []>} : vector<2x256xf32>, vector<8x256xf32>, vector<2x8xf32> -> vector<2x8xf32>
    %c0_3 = arith.constant 0 : index
    %c0_4 = arith.constant 0 : index
    %3 = vector.load %arg3[%c0_3, %c0_4] : memref<2x1xf32, #tpu.memory_space<vmem>>, vector<2x1xf32>
    %4 = vector.broadcast %3 : vector<2x1xf32> to vector<2x8xf32>
    %5 = arith.addf %2, %4 : vector<2x8xf32>
    %c0_5 = arith.constant 0 : index
    %c0_6 = arith.constant 0 : index
    %6 = vector.load %arg4[%c0_5, %c0_6] : memref<2x8xf32, #tpu.memory_space<vmem>>, vector<2x8xf32>
    tpu.vector_store %arg4[%c0_5, %c0_6], %5 {strides = array<i32>} : memref<2x8xf32, #tpu.memory_space<vmem>>, vector<2x8xf32>,
    return
  }
  func.func @transform_0(%arg0: i32) -> (i32, i32) {
    %c0_i32 = arith.constant 0 : i32
    %c0_i32_0 = arith.constant 0 : i32
    return %arg0, %c0_i32 : i32, i32
  }
  func.func @transform_1(%arg0: i32) -> (i32, i32) {
    %c0_i32 = arith.constant 0 : i32
    %c0_i32_0 = arith.constant 0 : i32
    %c0_i32_1 = arith.constant 0 : i32
    return %c0_i32, %c0_i32_0 : i32, i32
  }
  func.func @transform_2(%arg0: i32) -> (i32, i32) {
    %c0_i32 = arith.constant 0 : i32
    %c0_i32_0 = arith.constant 0 : i32
    %c0_i32_1 = arith.constant 0 : i32
    return %c0_i32, %c0_i32_0 : i32, i32
  }
  func.func @transform_3(%arg0: i32) -> (i32, i32) {
    %c0_i32 = arith.constant 0 : i32
    %c0_i32_0 = arith.constant 0 : i32
    return %c0_i32, %arg0 : i32, i32
  }
}

</mosaic_0001>

<bundles_post_ra>
// kernel: tpu_custom_call.1
= control target key start
LH: loop header
LB: loop body
LE: loop exit
PB: predicated region body
PF: predicated region fallthrough
CT: control target
= control target key end

     0   :  { %8 = vsyncpa [#allocation3], 0  ;;  %s240_s0 = inlined_call_operand.hbm [shape: f32[8,256], index: 0, kind: input, shape index: {}]   ;;  %s241_s1 = inlined_call_operand.vmem [shape: f32[2,256], index: 1, kind: input, shape index: {}]   ;;  %s242_s2 = inlined_call_operand.vmem [shape: f32[2,1], index: 2, kind: input, shape index: {}]   ;;  %s243_s3 = inlined_call_operand.hbm [shape: f32[2,8], index: 3, kind: output, shape index: {}]  }
   0x1   :  { %9 = vsyncpa [#allocation4], 0  ;;  %s187_s12 = smov [#allocation2]   ;;  %s139_s16 = scalar_lea.hbm %s240_s0, 256 }
   0x2   :  { %s16_s13 = sshll.u32 %s187_s12, 4  ;;  %p140_p0 = scmp.ne.s32.totalorder %s240_s0, %s139_s16  ;;  %s17_s13 = int_to_ptr.vmem [resolvable:$true] %s16_s13 }
   0x3   :  { %p143_p1 = scmp.lt.u32.totalorder %s139_s16, %s240_s0 }
   0x5   :  { %p145_p2 = pnand %p143_p1, %p140_p0 }
   0x7   :  { %148 = shalt.err (!%p145_p2)
}
   0x8   :  { %s149_s21 = scalar_lea.vmem %s17_s13, 256  ;;  %p154_p4 = scmp.lt.s32.totalorder %s17_s13, %s17_s13 }
   0x9   :  { %p150_p3 = scmp.ne.s32.totalorder %s17_s13, %s149_s21  ;;  %p155_p5 = scmp.lt.s32.totalorder %s149_s21, %s149_s21 }
   0xb   :  { %p156_p6 = por %p155_p5, %p154_p4 }
   0xd   :  { %p157_p7 = pnand %p156_p6, %p150_p3 }
   0xf   :  { %160 = shalt.err (!%p157_p7)
}
  0x10   :  { %19 = dma.hbm_to_vmem [thread:$0]  %s240_s0, 256, %s17_s13, [#allocation3]  }
  0x11   :  { %183 = dma.done.wait [#allocation3], 256  }
  0x12   :  { %184 = vsyncadd [#allocation3], 4294967040  ;;  %v188_v0 = vmov 0   ;;  %v29_v1 = vld [vmem:[#allocation2 + $0x8] sm:$0xff]  ;;  %v28_v2 = vld [vmem:[#allocation2] sm:$0xff]  ;;  %s189_s0 = smov [#allocation5]  }
  0x13   :  { %138 = vset.pattern.permute.xlu0 %v188_v0  ;;  %v134_v3 = vld.sshfl [vmem:[%s241_s1] sm:$0x33 pattern:$0x76325410]  ;;  %47 = vmatprep.subr.mxu0 %v29_v1  ;;  %s125_s28 = sshll.u32 %s189_s0, 4  ;;  %vm117_vm0 = vcmask 58368   ;;  %s126_s28 = int_to_ptr.vmem [resolvable:$true] %s125_s28 }
  0x14   :  { %v44_v4 = vcombine.high %v134_v3, %v134_v3  ;;  %v30_v5 = vld [vmem:[%s242_s2] sm:$0x3]  ;;  %48 = vmatpush1.xpose.msra.mxu0 %v28_v2  ;;  %s161_s1 = scalar_lea.vmem %s126_s28, 32  ;;  %p166_p9 = scmp.lt.s32.totalorder %s126_s28, %s126_s28 }
  0x15   :  { %33 = vperm.xlu0 %138, %v30_v5   ;;  %p162_p8 = scmp.ne.s32.totalorder %s126_s28, %s161_s1  ;;  %p167_p10 = scmp.lt.s32.totalorder %s161_s1, %s161_s1 }
  0x16   :  { %111 = vmatprep.mubr.f32.mxu0 %v44_v4 }
  0x17   :  { %112 = vmatmul.mubr.f32.vlgmr.msra.gmra.mrb[0].mxu0 %v134_v3  ;;  %p168_p11 = por %p167_p10, %p166_p9 }
  0x19   :  { %p169_p12 = pnand %p168_p11, %p162_p8 }
  0x94   :  { %v34_v6 = vpop.permute.xlu0 %33 }
  0xea   :  { %v113_v7 = vpop.f32.mrb[0].mxu0 }
  0xeb   :  { %v114_v8 = vadd.f32 %v113_v7, %v34_v6  ;;  %v115_v9 = vpop.f32.mrb[1].mxu0 }
  0xed   :  { %118 = vst.msk [vmem:[#allocation5] sm:$0x3] %vm117_vm0, %v114_v8 }
  0xee   :  { %172 = shalt.err (!%p169_p12)
}
  0xef   :  { %s173_s30 = scalar_lea.hbm %s243_s3, 32 }
  0xf0   :  { %p174_p13 = scmp.ne.s32.totalorder %s243_s3, %s173_s30  ;;  %p177_p0 = scmp.lt.u32.totalorder %s173_s30, %s243_s3 }
  0xf2   :  { %p179_p1 = pnand %p177_p0, %p174_p13 }
  0xf4   :  { %182 = shalt.err (!%p179_p1)
}
  0xf5   :  { %128 = dma.vmem_to_hbm [thread:$0]  %s126_s28, 32, %s243_s3, [#allocation4]  }
  0xf6   :  { %185 = dma.done.wait [#allocation4], 32  }
  0xf7   :  { %186 = vsyncadd [#allocation4], 4294967264 }
  0xf8   :  { %132 = vsyncpa [#allocation3], 1 }
  0xf9   :  { %133 = vsyncpa [#allocation4], 1 }

</bundles_post_ra>
